<compile_context>
chip_gen: v7x
topology: tpu7x:2x2x1
jax: 0.10.0
libtpu: 0.0.40
codegen_flags: <defaults>
</compile_context>

<pallas_src>
import functools

import jax
import jax.numpy as jnp
from jax import lax
from jax.experimental import pallas as pl
from jax.experimental.pallas import tpu as pltpu


def _sigmoid(x):
    # Single EUP push per element (jax.nn.sigmoid may lower to exp + divide).
    return 0.5 * (jnp.tanh(0.5 * x) + 1.0)


def _quasi_kernel(x_ref, w_ref, b_ref, hs_ref, f_s, i_s, o_s, c_carry,
                  *, TT, BB, HH, unroll):
    # x_ref : (TT, BB, K*Cin) bf16  time-major im2col slab
    # w_ref : (K*Cin, 3*HH)   bf16  fused conv taps, gates interleaved per H blk
    # b_ref : (1, 3*HH)       f32
    # hs_ref: (TT, BB, HH)    bf16  time-major hidden-state output block
    # f_s/i_s/o_s : (TT, BB, HH) f32 VMEM scratch
    # c_carry     : (BB, HH)     f32 persistent carry across time chunks
    t_chunk = pl.program_id(2)

    @pl.when(t_chunk == 0)
    def _():
        # PyTorch starts with c=None -> c_0 = (1-f_0)*z_0, identical to c=0.
        c_carry[...] = jnp.zeros_like(c_carry)

    kc = x_ref.shape[-1]
    x2d = x_ref[...].reshape(TT * BB, kc)

    # ONE fused MXU matmul for all three gates of this H block (bf16 in,
    # f32 accumulate).  Columns are [z | f | o], each HH wide.
    gates = jnp.dot(x2d, w_ref[...], preferred_element_type=jnp.float32)
    gates = gates + b_ref[...]
    zg = gates[:, :HH]
    fg = gates[:, HH:2 * HH]
    og = gates[:, 2 * HH:]

    # Gate nonlinearities + i = (1-f)*z hoisted out of the serial loop
    # (full-width VPU/EUP passes over the whole tile).
    f = _sigmoid(fg)
    z = jnp.tanh(zg)
    f_s[...] = f.reshape(TT, BB, HH)
    i_s[...] = ((1.0 - f) * z).reshape(TT, BB, HH)
    o_s[...] = _sigmoid(og).reshape(TT, BB, HH)
    # (bf16 gate scratches would halve VMEM/vld further; kept f32 to match the
    #  f32 reference recurrence exactly.)

    # Serial fo-pooling: c_t = f_t*c_{t-1} + i_t, c carried in vregs.
    # h_t = o_t*c_t is fused into the loop and stored directly to the output
    # block: no c_s scratch, no post-loop VMEM pass, one store per timestep.
    def body(t, c):
        c = f_s[t] * c + i_s[t]
        hs_ref[t] = (o_s[t] * c).astype(hs_ref.dtype)
        return c

    c_final = lax.fori_loop(0, TT, body, c_carry[...], unroll=unroll)
    c_carry[...] = c_final          # carry across time chunks


def _pick_hh(H, cap=512):
    """Largest H-block: full H when it is small or not 128-aligned, otherwise
    the biggest 128-multiple divisor of H that is <= cap."""
    if H % 128 != 0 or H <= cap:
        return H
    for d in range(cap - cap % 128, 127, -128):
        if d > 0 and H % d == 0:
            return d
    return 128


def _vmem_bytes(TT, BB, HH, KC):
    x_blk = TT * BB * KC * 2 * 2        # bf16 input block, double-buffered
    o_blk = TT * BB * HH * 2 * 2        # bf16 output block, double-buffered
    w_blk = KC * 3 * HH * 2 * 2         # bf16 weights (constant, still 2 bufs)
    b_blk = 3 * HH * 4 * 2
    scr = 3 * TT * BB * HH * 4 + BB * HH * 4
    return x_blk + o_blk + w_blk + b_blk + scr


def quasi_layer_forward(x, weight, bias, kernel_size, *,
                        t_chunk=128, h_chunk=512, vmem_limit_bytes=None):
    """QuasiLayer forward.

    x: (B, T, Cin) float32
    weight: (3H, Cin, K)  (torch Conv1d layout), bias: (3H,)
    Returns (hidden_states (B, T, H), h_last (B, 1, H)) -- same as PyTorch.
    """
    B, T, Cin = x.shape
    out3, _, K = weight.shape
    assert K == kernel_size
    H = out3 // 3
    KC = K * Cin

    # ---- batch blocking: BB=16 matches the bf16 (16,128) sublane tile --------
    if B <= 8:
        BB = Bp = B                       # block == full dim -> always legal
    else:
        BB = 16
        Bp = -(-B // 16) * 16

    # ---- H blocking (parallel axis): bounds VMEM, feeds v7x's 2nd core -------
    HH = _pick_hh(H, h_chunk)
    nH = H // HH

    # ---- time chunking: pad T up to a multiple of TT (never shrink TT) -------
    TT = min(t_chunk, T)
    budget = (vmem_limit_bytes if vmem_limit_bytes is not None else (32 << 20))
    budget -= 4 << 20                      # headroom for compiler scratch
    while _vmem_bytes(TT, BB, HH, KC) > budget and TT > 16:
        TT = max(16, TT // 2)
    Tp = -(-T // TT) * TT

    # ---- im2col slab: causal conv == one fused matmul per grid step ----------
    # (pure XLA layout plumbing; padded time rows are zeros at the end)
    x_pad = jnp.pad(x, ((0, Bp - B), (K - 1, Tp - T), (0, 0)))
    x_slab = jnp.concatenate([x_pad[:, k:k + Tp, :] for k in range(K)], axis=-1)
    x_tbk = jnp.transpose(x_slab, (1, 0, 2)).astype(jnp.bfloat16)   # (Tp,Bp,KC)

    # (3H, Cin, K) -> (KC, 3H), then interleave gates per H block so the kernel
    # sees one (KC, 3*HH) slab per h index: [z_h | f_h | o_h].
    w_t = jnp.transpose(weight, (2, 1, 0)).reshape(KC, 3 * H)
    wz = w_t[:, :H].reshape(KC, nH, HH)
    wf = w_t[:, H:2 * H].reshape(KC, nH, HH)
    wo = w_t[:, 2 * H:].reshape(KC, nH, HH)
    w_r = jnp.stack([wz, wf, wo], axis=2).reshape(KC, nH * 3 * HH)
    w_r = w_r.astype(jnp.bfloat16)

    b32 = bias.astype(jnp.float32)
    bz = b32[:H].reshape(nH, HH)
    bfg = b32[H:2 * H].reshape(nH, HH)
    bo = b32[2 * H:].reshape(nH, HH)
    b_r = jnp.stack([bz, bfg, bo], axis=1).reshape(1, nH * 3 * HH)

    unroll = min(8, TT)   # moderate unroll: LLO visibility without vreg blowup
    kernel = functools.partial(_quasi_kernel, TT=TT, BB=BB, HH=HH, unroll=unroll)

    hs_tbh = pl.pallas_call(
        kernel,
        out_shape=jax.ShapeDtypeStruct((Tp, Bp, H), jnp.bfloat16),
        grid_spec=pltpu.PrefetchScalarGridSpec(
            num_scalar_prefetch=0,
            grid=(Bp // BB, nH, Tp // TT),
            in_specs=[
                pl.BlockSpec((TT, BB, KC), lambda b, h, t: (t, b, 0)),
                # Constant-index weight/bias blocks are fetched once; a single
                # fused weight operand keeps their double-buffer footprint low.
                pl.BlockSpec((KC, 3 * HH), lambda b, h, t: (0, h)),
                pl.BlockSpec((1, 3 * HH), lambda b, h, t: (0, h)),
            ],
            out_specs=pl.BlockSpec((TT, BB, HH), lambda b, h, t: (t, b, h)),
            scratch_shapes=[
                pltpu.VMEM((TT, BB, HH), jnp.float32),   # f
                pltpu.VMEM((TT, BB, HH), jnp.float32),   # i = (1-f)*z
                pltpu.VMEM((TT, BB, HH), jnp.float32),   # o
                pltpu.VMEM((BB, HH), jnp.float32),       # c carry across chunks
            ],
        ),
        compiler_params=pltpu.CompilerParams(
            # Time axis MUST stay innermost + "arbitrary" (sequential carry);
            # batch/H axes are independent and safe to shard across cores.
            dimension_semantics=("parallel", "parallel", "arbitrary"),
            vmem_limit_bytes=vmem_limit_bytes),
    )(x_tbk, w_r, b_r)

    # Back to (B, T, H) f32.  bf16 kernel output halves writeback + transpose
    # HBM traffic; the cast restores the module's f32 interface.
    hs = jnp.transpose(hs_tbh, (1, 0, 2))[:B, :T].astype(jnp.float32)
    h_last = hs[:, -1:, :]                      # last real h_t, as in PyTorch
    return hs, h_last


def quasi_layer_reference(x, weight, bias, kernel_size):
    """Pure-JAX (f32) reference mirroring the PyTorch module."""
    B, T, Cin = x.shape
    H = weight.shape[0] // 3
    K = kernel_size
    x_pad = jnp.pad(x, ((0, 0), (K - 1, 0), (0, 0)))
    w = jnp.transpose(weight, (2, 1, 0))  # (K, Cin, 3H)
    gates = bias[None, None, :]
    for k in range(K):
        gates = gates + jnp.einsum('btc,ch->bth', x_pad[:, k:k + T, :], w[k])
    Z = jnp.tanh(gates[..., :H])
    F = jax.nn.sigmoid(gates[..., H:2 * H])
    O = jax.nn.sigmoid(gates[..., 2 * H:])
    c = jnp.zeros((B, H), jnp.float32)
    hs = []
    for t in range(T):
        c = F[:, t] * c + (1.0 - F[:, t]) * Z[:, t]
        hs.append(O[:, t] * c)
    hs = jnp.stack(hs, axis=1)
    return hs, hs[:, -1:, :]


if __name__ == "__main__":
    key = jax.random.PRNGKey(0)

    # ---- test 1: small canonical shapes -------------------------------------
    B, T, Cin, H, K = 2, 8, 4, 32, 3
    kx, kw, kb = jax.random.split(key, 3)
    x = jax.random.normal(kx, (B, T, Cin), dtype=jnp.float32)
    weight = jax.random.normal(kw, (3 * H, Cin, K), dtype=jnp.float32) * 0.1
    bias = jax.random.normal(kb, (3 * H,), dtype=jnp.float32) * 0.1

    hs, h_last = quasi_layer_forward(x, weight, bias, K)
    jax.block_until_ready((hs, h_last))
    hs_ref, h_last_ref = quasi_layer_reference(x, weight, bias, K)
    assert hs.shape == (B, T, H) and h_last.shape == (B, 1, H)
    assert jnp.allclose(hs, hs_ref, rtol=2e-2, atol=2e-2)
    assert jnp.allclose(h_last, h_last_ref, rtol=2e-2, atol=2e-2)

    # ---- test 2: exercises time padding + multi-chunk carry + odd batch -----
    B2, T2, Cin2, H2, K2 = 3, 150, 4, 32, 2
    kx2, kw2, kb2 = jax.random.split(jax.random.PRNGKey(1), 3)
    x2 = jax.random.normal(kx2, (B2, T2, Cin2), dtype=jnp.float32)
    w2 = jax.random.normal(kw2, (3 * H2, Cin2, K2), dtype=jnp.float32) * 0.1
    b2 = jax.random.normal(kb2, (3 * H2,), dtype=jnp.float32) * 0.1

    hs2, h_last2 = quasi_layer_forward(x2, w2, b2, K2)
    jax.block_until_ready((hs2, h_last2))
    hs2_ref, h_last2_ref = quasi_layer_reference(x2, w2, b2, K2)
    assert hs2.shape == (B2, T2, H2) and h_last2.shape == (B2, 1, H2)
    assert jnp.allclose(hs2, hs2_ref, rtol=2e-2, atol=2e-2)
    assert jnp.allclose(h_last2, h_last2_ref, rtol=2e-2, atol=2e-2)

    print("KERNEL_OK")
</pallas_src>

<mosaic_0001>
module attributes {stable_mosaic.version = 11 : i64} {
  func.func @_quasi_kernel(%arg0: i32, %arg1: i32, %arg2: i32, %arg3: memref<8x2x12xbf16, #tpu.memory_space<vmem>>, %arg4: memref<12x96xbf16, #tpu.memory_space<vmem>>, %arg5: memref<1x96xf32, #tpu.memory_space<vmem>>, %arg6: memref<8x2x32xbf16, #tpu.memory_space<vmem>>, %arg7: memref<8x2x32xf32, #tpu.memory_space<vmem>>, %arg8: memref<8x2x32xf32, #tpu.memory_space<vmem>>, %arg9: memref<8x2x32xf32, #tpu.memory_space<vmem>>, %arg10: memref<2x32xf32, #tpu.memory_space<vmem>>) attributes {dimension_semantics = [#tpu.dimension_semantics<parallel>, #tpu.dimension_semantics<parallel>, #tpu.dimension_semantics<arbitrary>], iteration_bounds = array<i64: 1, 1, 1>, scalar_prefetch = 0 : i64, scratch_operands = 4 : i64, tpu.core_type = #tpu.core_type<tc>, window_params = [{transform_indices = @transform_0, window_bounds = array<i64: 8, 2, 12>}, {transform_indices = @transform_1, window_bounds = array<i64: 12, 96>}, {transform_indices = @transform_2, window_bounds = array<i64: 1, 96>}, {transform_indices = @transform_3, window_bounds = array<i64: 8, 2, 32>}]} {
    %c0_i32 = arith.constant 0 : i32
    %0 = arith.cmpi eq, %arg2, %c0_i32 : i32
    %1 = arith.extui %0 : i1 to i32
    %c0_i32_0 = arith.constant 0 : i32
    %2 = arith.cmpi ne, %1, %c0_i32_0 : i32
    scf.if %2 {
      %cst_92 = arith.constant 0.000000e+00 : f32
      %175 = vector.broadcast %cst_92 : f32 to vector<2x32xf32>
      %c0_93 = arith.constant 0 : index
      %c0_94 = arith.constant 0 : index
      %176 = vector.load %arg10[%c0_93, %c0_94] : memref<2x32xf32, #tpu.memory_space<vmem>>, vector<2x32xf32>
      tpu.vector_store %arg10[%c0_93, %c0_94], %175 {strides = array<i32>} : memref<2x32xf32, #tpu.memory_space<vmem>>, vector<2x32xf32>,
    } else {
    }
    %c0 = arith.constant 0 : index
    %c0_1 = arith.constant 0 : index
    %c0_2 = arith.constant 0 : index
    %3 = vector.load %arg3[%c0, %c0_1, %c0_2] : memref<8x2x12xbf16, #tpu.memory_space<vmem>>, vector<8x2x12xbf16>
    %4 = vector.shape_cast %3 : vector<8x2x12xbf16> to vector<16x12xbf16>
    %c0_3 = arith.constant 0 : index
    %c0_4 = arith.constant 0 : index
    %5 = vector.load %arg4[%c0_3, %c0_4] : memref<12x96xbf16, #tpu.memory_space<vmem>>, vector<12x96xbf16>
    %cst = arith.constant dense<0.000000e+00> : vector<16x96xf32>
    %6 = tpu.matmul %4, %5, %cst {dimension_numbers = #tpu.dot_dimension_numbers<[1], [0], [0], [1], [0, 0, 1, 1], [], []>} : vector<16x12xbf16>, vector<12x96xbf16>, vector<16x96xf32> -> vector<16x96xf32>
    %c0_5 = arith.constant 0 : index
    %c0_6 = arith.constant 0 : index
    %7 = vector.load %arg5[%c0_5, %c0_6] : memref<1x96xf32, #tpu.memory_space<vmem>>, vector<1x96xf32>
    %8 = vector.broadcast %7 : vector<1x96xf32> to vector<16x96xf32>
    %9 = arith.addf %6, %8 : vector<16x96xf32>
    %10 = vector.extract_strided_slice %9 {offsets = [0, 0], sizes = [16, 32], strides = [1, 1]} : vector<16x96xf32> to vector<16x32xf32>
    %11 = vector.extract_strided_slice %9 {offsets = [0, 32], sizes = [16, 32], strides = [1, 1]} : vector<16x96xf32> to vector<16x32xf32>
    %12 = vector.extract_strided_slice %9 {offsets = [0, 64], sizes = [16, 32], strides = [1, 1]} : vector<16x96xf32> to vector<16x32xf32>
    %cst_7 = arith.constant 5.000000e-01 : f32
    %13 = vector.broadcast %cst_7 : f32 to vector<16x32xf32>
    %14 = arith.mulf %13, %11 : vector<16x32xf32>
    %15 = math.tanh %14 : vector<16x32xf32>
    %cst_8 = arith.constant 1.000000e+00 : f32
    %16 = vector.broadcast %cst_8 : f32 to vector<16x32xf32>
    %17 = arith.addf %15, %16 : vector<16x32xf32>
    %cst_9 = arith.constant 5.000000e-01 : f32
    %18 = vector.broadcast %cst_9 : f32 to vector<16x32xf32>
    %19 = arith.mulf %18, %17 : vector<16x32xf32>
    %20 = math.tanh %10 : vector<16x32xf32>
    %21 = vector.shape_cast %19 : vector<16x32xf32> to vector<8x2x32xf32>
    %c0_10 = arith.constant 0 : index
    %c0_11 = arith.constant 0 : index
    %c0_12 = arith.constant 0 : index
    %22 = vector.load %arg7[%c0_10, %c0_11, %c0_12] : memref<8x2x32xf32, #tpu.memory_space<vmem>>, vector<8x2x32xf32>
    tpu.vector_store %arg7[%c0_10, %c0_11, %c0_12], %21 {strides = array<i32>} : memref<8x2x32xf32, #tpu.memory_space<vmem>>, vector<8x2x32xf32>,
    %cst_13 = arith.constant 1.000000e+00 : f32
    %23 = vector.broadcast %cst_13 : f32 to vector<16x32xf32>
    %24 = arith.subf %23, %19 : vector<16x32xf32>
    %25 = arith.mulf %24, %20 : vector<16x32xf32>
    %26 = vector.shape_cast %25 : vector<16x32xf32> to vector<8x2x32xf32>
    %c0_14 = arith.constant 0 : index
    %c0_15 = arith.constant 0 : index
    %c0_16 = arith.constant 0 : index
    %27 = vector.load %arg8[%c0_14, %c0_15, %c0_16] : memref<8x2x32xf32, #tpu.memory_space<vmem>>, vector<8x2x32xf32>
    tpu.vector_store %arg8[%c0_14, %c0_15, %c0_16], %26 {strides = array<i32>} : memref<8x2x32xf32, #tpu.memory_space<vmem>>, vector<8x2x32xf32>,
    %cst_17 = arith.constant 5.000000e-01 : f32
    %28 = vector.broadcast %cst_17 : f32 to vector<16x32xf32>
    %29 = arith.mulf %28, %12 : vector<16x32xf32>
    %30 = math.tanh %29 : vector<16x32xf32>
    %cst_18 = arith.constant 1.000000e+00 : f32
    %31 = vector.broadcast %cst_18 : f32 to vector<16x32xf32>
    %32 = arith.addf %30, %31 : vector<16x32xf32>
    %cst_19 = arith.constant 5.000000e-01 : f32
    %33 = vector.broadcast %cst_19 : f32 to vector<16x32xf32>
    %34 = arith.mulf %33, %32 : vector<16x32xf32>
    %35 = vector.shape_cast %34 : vector<16x32xf32> to vector<8x2x32xf32>
    %c0_20 = arith.constant 0 : index
    %c0_21 = arith.constant 0 : index
    %c0_22 = arith.constant 0 : index
    %36 = vector.load %arg9[%c0_20, %c0_21, %c0_22] : memref<8x2x32xf32, #tpu.memory_space<vmem>>, vector<8x2x32xf32>
    tpu.vector_store %arg9[%c0_20, %c0_21, %c0_22], %35 {strides = array<i32>} : memref<8x2x32xf32, #tpu.memory_space<vmem>>, vector<8x2x32xf32>,
    %c0_23 = arith.constant 0 : index
    %c0_24 = arith.constant 0 : index
    %37 = vector.load %arg10[%c0_23, %c0_24] : memref<2x32xf32, #tpu.memory_space<vmem>>, vector<2x32xf32>
    %c0_i32_25 = arith.constant 0 : i32
    %38 = arith.index_cast %c0_i32_25 : i32 to index
    %c0_26 = arith.constant 0 : index
    %c0_27 = arith.constant 0 : index
    %39 = vector.load %arg7[%38, %c0_26, %c0_27] : memref<8x2x32xf32, #tpu.memory_space<vmem>>, vector<1x2x32xf32>
    %40 = vector.shape_cast %39 : vector<1x2x32xf32> to vector<2x32xf32>
    %41 = arith.mulf %40, %37 : vector<2x32xf32>
    %42 = arith.index_cast %c0_i32_25 : i32 to index
    %c0_28 = arith.constant 0 : index
    %c0_29 = arith.constant 0 : index
    %43 = vector.load %arg8[%42, %c0_28, %c0_29] : memref<8x2x32xf32, #tpu.memory_space<vmem>>, vector<1x2x32xf32>
    %44 = vector.shape_cast %43 : vector<1x2x32xf32> to vector<2x32xf32>
    %45 = arith.addf %41, %44 : vector<2x32xf32>
    %46 = arith.index_cast %c0_i32_25 : i32 to index
    %c0_30 = arith.constant 0 : index
    %c0_31 = arith.constant 0 : index
    %47 = vector.load %arg9[%46, %c0_30, %c0_31] : memref<8x2x32xf32, #tpu.memory_space<vmem>>, vector<1x2x32xf32>
    %48 = vector.shape_cast %47 : vector<1x2x32xf32> to vector<2x32xf32>
    %49 = arith.mulf %48, %45 : vector<2x32xf32>
    %50 = arith.truncf %49 : vector<2x32xf32> to vector<2x32xbf16>
    %51 = arith.index_cast %c0_i32_25 : i32 to index
    %c0_32 = arith.constant 0 : index
    %c0_33 = arith.constant 0 : index
    %52 = vector.load %arg6[%51, %c0_32, %c0_33] : memref<8x2x32xbf16, #tpu.memory_space<vmem>>, vector<1x2x32xbf16>
    %53 = vector.shape_cast %52 : vector<1x2x32xbf16> to vector<2x32xbf16>
    %54 = vector.shape_cast %50 : vector<2x32xbf16> to vector<1x2x32xbf16>
    tpu.vector_store %arg6[%51, %c0_32, %c0_33], %54 {strides = array<i32>} : memref<8x2x32xbf16, #tpu.memory_space<vmem>>, vector<1x2x32xbf16>,
    %c1_i32 = arith.constant 1 : i32
    %55 = arith.index_cast %c1_i32 : i32 to index
    %c0_34 = arith.constant 0 : index
    %c0_35 = arith.constant 0 : index
    %56 = vector.load %arg7[%55, %c0_34, %c0_35] : memref<8x2x32xf32, #tpu.memory_space<vmem>>, vector<1x2x32xf32>
    %57 = vector.shape_cast %56 : vector<1x2x32xf32> to vector<2x32xf32>
    %58 = arith.mulf %57, %45 : vector<2x32xf32>
    %59 = arith.index_cast %c1_i32 : i32 to index
    %c0_36 = arith.constant 0 : index
    %c0_37 = arith.constant 0 : index
    %60 = vector.load %arg8[%59, %c0_36, %c0_37] : memref<8x2x32xf32, #tpu.memory_space<vmem>>, vector<1x2x32xf32>
    %61 = vector.shape_cast %60 : vector<1x2x32xf32> to vector<2x32xf32>
    %62 = arith.addf %58, %61 : vector<2x32xf32>
    %63 = arith.index_cast %c1_i32 : i32 to index
    %c0_38 = arith.constant 0 : index
    %c0_39 = arith.constant 0 : index
    %64 = vector.load %arg9[%63, %c0_38, %c0_39] : memref<8x2x32xf32, #tpu.memory_space<vmem>>, vector<1x2x32xf32>
    %65 = vector.shape_cast %64 : vector<1x2x32xf32> to vector<2x32xf32>
    %66 = arith.mulf %65, %62 : vector<2x32xf32>
    %67 = arith.truncf %66 : vector<2x32xf32> to vector<2x32xbf16>
    %68 = arith.index_cast %c1_i32 : i32 to index
    %c0_40 = arith.constant 0 : index
    %c0_41 = arith.constant 0 : index
    %69 = vector.load %arg6[%68, %c0_40, %c0_41] : memref<8x2x32xbf16, #tpu.memory_space<vmem>>, vector<1x2x32xbf16>
    %70 = vector.shape_cast %69 : vector<1x2x32xbf16> to vector<2x32xbf16>
    %71 = vector.shape_cast %67 : vector<2x32xbf16> to vector<1x2x32xbf16>
    tpu.vector_store %arg6[%68, %c0_40, %c0_41], %71 {strides = array<i32>} : memref<8x2x32xbf16, #tpu.memory_space<vmem>>, vector<1x2x32xbf16>,
    %c2_i32 = arith.constant 2 : i32
    %72 = arith.index_cast %c2_i32 : i32 to index
    %c0_42 = arith.constant 0 : index
    %c0_43 = arith.constant 0 : index
    %73 = vector.load %arg7[%72, %c0_42, %c0_43] : memref<8x2x32xf32, #tpu.memory_space<vmem>>, vector<1x2x32xf32>
    %74 = vector.shape_cast %73 : vector<1x2x32xf32> to vector<2x32xf32>
    %75 = arith.mulf %74, %62 : vector<2x32xf32>
    %76 = arith.index_cast %c2_i32 : i32 to index
    %c0_44 = arith.constant 0 : index
    %c0_45 = arith.constant 0 : index
    %77 = vector.load %arg8[%76, %c0_44, %c0_45] : memref<8x2x32xf32, #tpu.memory_space<vmem>>, vector<1x2x32xf32>
    %78 = vector.shape_cast %77 : vector<1x2x32xf32> to vector<2x32xf32>
    %79 = arith.addf %75, %78 : vector<2x32xf32>
    %80 = arith.index_cast %c2_i32 : i32 to index
    %c0_46 = arith.constant 0 : index
    %c0_47 = arith.constant 0 : index
    %81 = vector.load %arg9[%80, %c0_46, %c0_47] : memref<8x2x32xf32, #tpu.memory_space<vmem>>, vector<1x2x32xf32>
    %82 = vector.shape_cast %81 : vector<1x2x32xf32> to vector<2x32xf32>
    %83 = arith.mulf %82, %79 : vector<2x32xf32>
    %84 = arith.truncf %83 : vector<2x32xf32> to vector<2x32xbf16>
    %85 = arith.index_cast %c2_i32 : i32 to index
    %c0_48 = arith.constant 0 : index
    %c0_49 = arith.constant 0 : index
    %86 = vector.load %arg6[%85, %c0_48, %c0_49] : memref<8x2x32xbf16, #tpu.memory_space<vmem>>, vector<1x2x32xbf16>
    %87 = vector.shape_cast %86 : vector<1x2x32xbf16> to vector<2x32xbf16>
    %88 = vector.shape_cast %84 : vector<2x32xbf16> to vector<1x2x32xbf16>
    tpu.vector_store %arg6[%85, %c0_48, %c0_49], %88 {strides = array<i32>} : memref<8x2x32xbf16, #tpu.memory_space<vmem>>, vector<1x2x32xbf16>,
    %c3_i32 = arith.constant 3 : i32
    %89 = arith.index_cast %c3_i32 : i32 to index
    %c0_50 = arith.constant 0 : index
    %c0_51 = arith.constant 0 : index
    %90 = vector.load %arg7[%89, %c0_50, %c0_51] : memref<8x2x32xf32, #tpu.memory_space<vmem>>, vector<1x2x32xf32>
    %91 = vector.shape_cast %90 : vector<1x2x32xf32> to vector<2x32xf32>
    %92 = arith.mulf %91, %79 : vector<2x32xf32>
    %93 = arith.index_cast %c3_i32 : i32 to index
    %c0_52 = arith.constant 0 : index
    %c0_53 = arith.constant 0 : index
    %94 = vector.load %arg8[%93, %c0_52, %c0_53] : memref<8x2x32xf32, #tpu.memory_space<vmem>>, vector<1x2x32xf32>
    %95 = vector.shape_cast %94 : vector<1x2x32xf32> to vector<2x32xf32>
    %96 = arith.addf %92, %95 : vector<2x32xf32>
    %97 = arith.index_cast %c3_i32 : i32 to index
    %c0_54 = arith.constant 0 : index
    %c0_55 = arith.constant 0 : index
    %98 = vector.load %arg9[%97, %c0_54, %c0_55] : memref<8x2x32xf32, #tpu.memory_space<vmem>>, vector<1x2x32xf32>
    %99 = vector.shape_cast %98 : vector<1x2x32xf32> to vector<2x32xf32>
    %100 = arith.mulf %99, %96 : vector<2x32xf32>
    %101 = arith.truncf %100 : vector<2x32xf32> to vector<2x32xbf16>
    %102 = arith.index_cast %c3_i32 : i32 to index
    %c0_56 = arith.constant 0 : index
    %c0_57 = arith.constant 0 : index
    %103 = vector.load %arg6[%102, %c0_56, %c0_57] : memref<8x2x32xbf16, #tpu.memory_space<vmem>>, vector<1x2x32xbf16>
    %104 = vector.shape_cast %103 : vector<1x2x32xbf16> to vector<2x32xbf16>
    %105 = vector.shape_cast %101 : vector<2x32xbf16> to vector<1x2x32xbf16>
    tpu.vector_store %arg6[%102, %c0_56, %c0_57], %105 {strides = array<i32>} : memref<8x2x32xbf16, #tpu.memory_space<vmem>>, vector<1x2x32xbf16>,
    %c4_i32 = arith.constant 4 : i32
    %106 = arith.index_cast %c4_i32 : i32 to index
    %c0_58 = arith.constant 0 : index
    %c0_59 = arith.constant 0 : index
    %107 = vector.load %arg7[%106, %c0_58, %c0_59] : memref<8x2x32xf32, #tpu.memory_space<vmem>>, vector<1x2x32xf32>
    %108 = vector.shape_cast %107 : vector<1x2x32xf32> to vector<2x32xf32>
    %109 = arith.mulf %108, %96 : vector<2x32xf32>
    %110 = arith.index_cast %c4_i32 : i32 to index
    %c0_60 = arith.constant 0 : index
    %c0_61 = arith.constant 0 : index
    %111 = vector.load %arg8[%110, %c0_60, %c0_61] : memref<8x2x32xf32, #tpu.memory_space<vmem>>, vector<1x2x32xf32>
    %112 = vector.shape_cast %111 : vector<1x2x32xf32> to vector<2x32xf32>
    %113 = arith.addf %109, %112 : vector<2x32xf32>
    %114 = arith.index_cast %c4_i32 : i32 to index
    %c0_62 = arith.constant 0 : index
    %c0_63 = arith.constant 0 : index
    %115 = vector.load %arg9[%114, %c0_62, %c0_63] : memref<8x2x32xf32, #tpu.memory_space<vmem>>, vector<1x2x32xf32>
    %116 = vector.shape_cast %115 : vector<1x2x32xf32> to vector<2x32xf32>
    %117 = arith.mulf %116, %113 : vector<2x32xf32>
    %118 = arith.truncf %117 : vector<2x32xf32> to vector<2x32xbf16>
    %119 = arith.index_cast %c4_i32 : i32 to index
    %c0_64 = arith.constant 0 : index
    %c0_65 = arith.constant 0 : index
    %120 = vector.load %arg6[%119, %c0_64, %c0_65] : memref<8x2x32xbf16, #tpu.memory_space<vmem>>, vector<1x2x32xbf16>
    %121 = vector.shape_cast %120 : vector<1x2x32xbf16> to vector<2x32xbf16>
    %122 = vector.shape_cast %118 : vector<2x32xbf16> to vector<1x2x32xbf16>
    tpu.vector_store %arg6[%119, %c0_64, %c0_65], %122 {strides = array<i32>} : memref<8x2x32xbf16, #tpu.memory_space<vmem>>, vector<1x2x32xbf16>,
    %c5_i32 = arith.constant 5 : i32
    %123 = arith.index_cast %c5_i32 : i32 to index
    %c0_66 = arith.constant 0 : index
    %c0_67 = arith.constant 0 : index
    %124 = vector.load %arg7[%123, %c0_66, %c0_67] : memref<8x2x32xf32, #tpu.memory_space<vmem>>, vector<1x2x32xf32>
    %125 = vector.shape_cast %124 : vector<1x2x32xf32> to vector<2x32xf32>
    %126 = arith.mulf %125, %113 : vector<2x32xf32>
    %127 = arith.index_cast %c5_i32 : i32 to index
    %c0_68 = arith.constant 0 : index
    %c0_69 = arith.constant 0 : index
    %128 = vector.load %arg8[%127, %c0_68, %c0_69] : memref<8x2x32xf32, #tpu.memory_space<vmem>>, vector<1x2x32xf32>
    %129 = vector.shape_cast %128 : vector<1x2x32xf32> to vector<2x32xf32>
    %130 = arith.addf %126, %129 : vector<2x32xf32>
    %131 = arith.index_cast %c5_i32 : i32 to index
    %c0_70 = arith.constant 0 : index
    %c0_71 = arith.constant 0 : index
    %132 = vector.load %arg9[%131, %c0_70, %c0_71] : memref<8x2x32xf32, #tpu.memory_space<vmem>>, vector<1x2x32xf32>
    %133 = vector.shape_cast %132 : vector<1x2x32xf32> to vector<2x32xf32>
    %134 = arith.mulf %133, %130 : vector<2x32xf32>
    %135 = arith.truncf %134 : vector<2x32xf32> to vector<2x32xbf16>
    %136 = arith.index_cast %c5_i32 : i32 to index
    %c0_72 = arith.constant 0 : index
    %c0_73 = arith.constant 0 : index
    %137 = vector.load %arg6[%136, %c0_72, %c0_73] : memref<8x2x32xbf16, #tpu.memory_space<vmem>>, vector<1x2x32xbf16>
    %138 = vector.shape_cast %137 : vector<1x2x32xbf16> to vector<2x32xbf16>
    %139 = vector.shape_cast %135 : vector<2x32xbf16> to vector<1x2x32xbf16>
    tpu.vector_store %arg6[%136, %c0_72, %c0_73], %139 {strides = array<i32>} : memref<8x2x32xbf16, #tpu.memory_space<vmem>>, vector<1x2x32xbf16>,
    %c6_i32 = arith.constant 6 : i32
    %140 = arith.index_cast %c6_i32 : i32 to index
    %c0_74 = arith.constant 0 : index
    %c0_75 = arith.constant 0 : index
    %141 = vector.load %arg7[%140, %c0_74, %c0_75] : memref<8x2x32xf32, #tpu.memory_space<vmem>>, vector<1x2x32xf32>
    %142 = vector.shape_cast %141 : vector<1x2x32xf32> to vector<2x32xf32>
    %143 = arith.mulf %142, %130 : vector<2x32xf32>
    %144 = arith.index_cast %c6_i32 : i32 to index
    %c0_76 = arith.constant 0 : index
    %c0_77 = arith.constant 0 : index
    %145 = vector.load %arg8[%144, %c0_76, %c0_77] : memref<8x2x32xf32, #tpu.memory_space<vmem>>, vector<1x2x32xf32>
    %146 = vector.shape_cast %145 : vector<1x2x32xf32> to vector<2x32xf32>
    %147 = arith.addf %143, %146 : vector<2x32xf32>
    %148 = arith.index_cast %c6_i32 : i32 to index
    %c0_78 = arith.constant 0 : index
    %c0_79 = arith.constant 0 : index
    %149 = vector.load %arg9[%148, %c0_78, %c0_79] : memref<8x2x32xf32, #tpu.memory_space<vmem>>, vector<1x2x32xf32>
    %150 = vector.shape_cast %149 : vector<1x2x32xf32> to vector<2x32xf32>
    %151 = arith.mulf %150, %147 : vector<2x32xf32>
    %152 = arith.truncf %151 : vector<2x32xf32> to vector<2x32xbf16>
    %153 = arith.index_cast %c6_i32 : i32 to index
    %c0_80 = arith.constant 0 : index
    %c0_81 = arith.constant 0 : index
    %154 = vector.load %arg6[%153, %c0_80, %c0_81] : memref<8x2x32xbf16, #tpu.memory_space<vmem>>, vector<1x2x32xbf16>
    %155 = vector.shape_cast %154 : vector<1x2x32xbf16> to vector<2x32xbf16>
    %156 = vector.shape_cast %152 : vector<2x32xbf16> to vector<1x2x32xbf16>
    tpu.vector_store %arg6[%153, %c0_80, %c0_81], %156 {strides = array<i32>} : memref<8x2x32xbf16, #tpu.memory_space<vmem>>, vector<1x2x32xbf16>,
    %c7_i32 = arith.constant 7 : i32
    %157 = arith.index_cast %c7_i32 : i32 to index
    %c0_82 = arith.constant 0 : index
    %c0_83 = arith.constant 0 : index
    %158 = vector.load %arg7[%157, %c0_82, %c0_83] : memref<8x2x32xf32, #tpu.memory_space<vmem>>, vector<1x2x32xf32>
    %159 = vector.shape_cast %158 : vector<1x2x32xf32> to vector<2x32xf32>
    %160 = arith.mulf %159, %147 : vector<2x32xf32>
    %161 = arith.index_cast %c7_i32 : i32 to index
    %c0_84 = arith.constant 0 : index
    %c0_85 = arith.constant 0 : index
    %162 = vector.load %arg8[%161, %c0_84, %c0_85] : memref<8x2x32xf32, #tpu.memory_space<vmem>>, vector<1x2x32xf32>
    %163 = vector.shape_cast %162 : vector<1x2x32xf32> to vector<2x32xf32>
    %164 = arith.addf %160, %163 : vector<2x32xf32>
    %165 = arith.index_cast %c7_i32 : i32 to index
    %c0_86 = arith.constant 0 : index
    %c0_87 = arith.constant 0 : index
    %166 = vector.load %arg9[%165, %c0_86, %c0_87] : memref<8x2x32xf32, #tpu.memory_space<vmem>>, vector<1x2x32xf32>
    %167 = vector.shape_cast %166 : vector<1x2x32xf32> to vector<2x32xf32>
    %168 = arith.mulf %167, %164 : vector<2x32xf32>
    %169 = arith.truncf %168 : vector<2x32xf32> to vector<2x32xbf16>
    %170 = arith.index_cast %c7_i32 : i32 to index
    %c0_88 = arith.constant 0 : index
    %c0_89 = arith.constant 0 : index
    %171 = vector.load %arg6[%170, %c0_88, %c0_89] : memref<8x2x32xbf16, #tpu.memory_space<vmem>>, vector<1x2x32xbf16>
    %172 = vector.shape_cast %171 : vector<1x2x32xbf16> to vector<2x32xbf16>
    %173 = vector.shape_cast %169 : vector<2x32xbf16> to vector<1x2x32xbf16>
    tpu.vector_store %arg6[%170, %c0_88, %c0_89], %173 {strides = array<i32>} : memref<8x2x32xbf16, #tpu.memory_space<vmem>>, vector<1x2x32xbf16>,
    %c8_i32 = arith.constant 8 : i32
    %c0_90 = arith.constant 0 : index
    %c0_91 = arith.constant 0 : index
    %174 = vector.load %arg10[%c0_90, %c0_91] : memref<2x32xf32, #tpu.memory_space<vmem>>, vector<2x32xf32>
    tpu.vector_store %arg10[%c0_90, %c0_91], %164 {strides = array<i32>} : memref<2x32xf32, #tpu.memory_space<vmem>>, vector<2x32xf32>,
    return
  }
  func.func @transform_0(%arg0: i32, %arg1: i32, %arg2: i32) -> (i32, i32, i32) {
    %c0_i32 = arith.constant 0 : i32
    %c0_i32_0 = arith.constant 0 : i32
    return %arg2, %arg0, %c0_i32 : i32, i32, i32
  }
  func.func @transform_1(%arg0: i32, %arg1: i32, %arg2: i32) -> (i32, i32) {
    %c0_i32 = arith.constant 0 : i32
    %c0_i32_0 = arith.constant 0 : i32
    return %c0_i32, %arg1 : i32, i32
  }
  func.func @transform_2(%arg0: i32, %arg1: i32, %arg2: i32) -> (i32, i32) {
    %c0_i32 = arith.constant 0 : i32
    %c0_i32_0 = arith.constant 0 : i32
    return %c0_i32, %arg1 : i32, i32
  }
  func.func @transform_3(%arg0: i32, %arg1: i32, %arg2: i32) -> (i32, i32, i32) {
    %c0_i32 = arith.constant 0 : i32
    return %arg2, %arg0, %arg1 : i32, i32, i32
  }
}

</mosaic_0001>

<bundles_post_ra>
// kernel: tpu_custom_call.1
= control target key start
LH: loop header
LB: loop body
LE: loop exit
PB: predicated region body
PF: predicated region fallthrough
CT: control target
= control target key end

     0   :  { %8 = vsyncpa [#allocation7], 0  ;;  %s863_s0 = inlined_call_operand.hbm [shape: bf16[8,2,12], index: 0, kind: input, shape index: {}]   ;;  %s864_s1 = inlined_call_operand.hbm [shape: bf16[12,96], index: 1, kind: input, shape index: {}]   ;;  %s865_s2 = inlined_call_operand.vmem [shape: f32[1,96], index: 2, kind: input, shape index: {}]   ;;  %s866_s3 = inlined_call_operand.hbm [shape: bf16[8,2,32], index: 3, kind: output, shape index: {}]  }
   0x1   :  { %9 = vsyncpa [#allocation10], 0 }
   0x2   :  { %10 = vsyncpa [#allocation8], 0  ;;  %s699_s12 = smov [#allocation6]   ;;  %s627_s16 = scalar_lea.hbm %s863_s0, 128 }
   0x3   :  { %s16_s13 = sshll.u32 %s699_s12, 4  ;;  %p628_p0 = scmp.ne.s32.totalorder %s863_s0, %s627_s16  ;;  %s17_s13 = int_to_ptr.vmem [resolvable:$true] %s16_s13 }
   0x4   :  { %p631_p1 = scmp.lt.u32.totalorder %s627_s16, %s863_s0 }
   0x6   :  { %p633_p2 = pnand %p631_p1, %p628_p0 }
   0x8   :  { %636 = shalt.err (!%p633_p2)
}
   0x9   :  { %s637_s21 = scalar_lea.vmem %s17_s13, 128  ;;  %p642_p4 = scmp.lt.s32.totalorder %s17_s13, %s17_s13 }
   0xa   :  { %p638_p3 = scmp.ne.s32.totalorder %s17_s13, %s637_s21  ;;  %p643_p5 = scmp.lt.s32.totalorder %s637_s21, %s637_s21 }
   0xc   :  { %p644_p6 = por %p643_p5, %p642_p4 }
   0xe   :  { %p645_p7 = pnand %p644_p6, %p638_p3 }
  0x10   :  { %648 = shalt.err (!%p645_p7)
}
  0x11   :  { %s700_s22 = smov 16   ;;  %s701_s23 = smov 1  }
  0x12   :  { %22 = dma.hbm_to_vmem [thread:$0]  %s863_s0, 128, %s17_s13, [#allocation7], %s700_s22, %s700_s22, %s701_s23  }
  0x13   :  { %s702_s26 = smov [#allocation9]   ;;  %s649_s30 = scalar_lea.hbm %s864_s1, 128 }
  0x14   :  { %s28_s27 = sshll.u32 %s702_s26, 4  ;;  %p650_p8 = scmp.ne.s32.totalorder %s864_s1, %s649_s30  ;;  %s29_s27 = int_to_ptr.vmem [resolvable:$true] %s28_s27 }
  0x15   :  { %p653_p9 = scmp.lt.u32.totalorder %s649_s30, %s864_s1 }
  0x17   :  { %p655_p10 = pnand %p653_p9, %p650_p8 }
  0x19   :  { %658 = shalt.err (!%p655_p10)
}
  0x1a   :  { %s659_s8 = scalar_lea.vmem %s29_s27, 128  ;;  %p664_p12 = scmp.lt.s32.totalorder %s29_s27, %s29_s27 }
  0x1b   :  { %p660_p11 = scmp.ne.s32.totalorder %s29_s27, %s659_s8  ;;  %p665_p13 = scmp.lt.s32.totalorder %s659_s8, %s659_s8 }
  0x1d   :  { %p666_p0 = por %p665_p13, %p664_p12 }
  0x1f   :  { %p667_p1 = pnand %p666_p0, %p660_p11 }
  0x21   :  { %670 = shalt.err (!%p667_p1)
}
  0x22   :  { %s703_s0 = smov 64   ;;  %s704_s9 = smov 4  }
  0x23   :  { %34 = dma.hbm_to_vmem [thread:$0]  %s864_s1, 128, %s29_s27, [#allocation10], %s703_s0, %s703_s0, %s704_s9  }
  0x24   :  { %693 = dma.done.wait [#allocation7], 128  }
  0x25   :  { %694 = vsyncadd [#allocation7], 4294967168 }
  0x26   :  { %695 = dma.done.wait [#allocation10], 128  }
  0x27   :  { %696 = vsyncadd [#allocation10], 4294967168  ;;  %vm48_vm0 = vcmask 254976   ;;  %v705_v0 = vmov 0.0   ;;  %vm706_vm1 = vmmov 0   ;;  %v82_v1 = vlaneseq  ;;  %s709_s13 = smov 32  }
  0x28   :  { %49 = vst.msk [vmem:[#allocation5] sm:$0x3] %vm48_vm0, %v705_v0  ;;  %599 = vmatprep.subr.bf16.mxu0 %v705_v0  ;;  %601 = vmatprep.mubr.msk.bf16.mxu0 %vm706_vm1, %v705_v0  ;;  %v707_v2 = vmov 1966171168   ;;  %vm133_vm2 = vcmask 1045504   ;;  %vm129_vm3 = vcmask 97280  }
  0x29   :  { %v80_v3 = vunpack.c.l.s4 %v707_v2  ;;  %v83_v4 = vshrl.u32 %v82_v1, 7  ;;  %v618_v6 = vld [vmem:[#allocation9] sm:$0x3f]   ;;  %v50_v8 = vld [vmem:[#allocation6] sm:$0x1]  ;;  %vm489_vm4 = vcmask 253952  }
  0x2a   :  { %v51_v9 = vld [vmem:[#allocation6 + $0x1] sm:$0x1]  ;;  %v52_v10 = vld [vmem:[#allocation6 + $0x2] sm:$0x1]  ;;  %v135_v11 = vsel %vm133_vm2, %v618_v6, 0  ;;  %s711_s14 = smov [#allocation11]  }
  0x2b   :  { %v81_v5 = vunpack.c.0.s8 %v80_v3  ;;  %v53_v12 = vld [vmem:[#allocation6 + $0x3] sm:$0x1]  ;;  %v54_v13 = vld [vmem:[#allocation6 + $0x4] sm:$0x1]  ;;  %v75_v14 = vcombine.low %v50_v8, %v51_v9  ;;  %600 = vmatpush3.bf16.msra.mxu0 %v135_v11  ;;  %v55_v15 = vld [vmem:[#allocation6 + $0x5] sm:$0x1] }
  0x2c   :  { %v56_v16 = vld [vmem:[#allocation6 + $0x6] sm:$0x1]  ;;  %v57_v17 = vld [vmem:[#allocation6 + $0x7] sm:$0x1]  ;;  %v76_v18 = vcombine.low %v52_v10, %v53_v12  ;;  %v77_v19 = vcombine.low %v54_v13, %v55_v15  ;;  %v594_v30 = vld [vmem:[%s865_s2] ss:$0 sm:$0xff] }
  0x2d   :  { %v84_v7 = vsub.s32 %v81_v5, %v83_v4  ;;  %v78_v20 = vcombine.low %v56_v16, %v57_v17  ;;  %v708_v39 = vmov 1983009808   ;;  %s710_s2 = smov 96   ;;  %s581_s15 = sshll.u32 %s711_s14, 4  ;;  %s582_s15 = int_to_ptr.vmem [resolvable:$true] %s581_s15 }
  0x2e   :  { %v192_v40 = vunpack.c.l.s4 %v708_v39  ;;  %s671_s16 = scalar_lea.vmem %s582_s15, 128  ;;  %p676_p3 = scmp.lt.s32.totalorder %s582_s15, %s582_s15 }
  0x2f   :  { %v85_v21 = vrot.slane %v75_v14, %v84_v7  ;;  %v92_v22 = vrot.slane %v76_v18, %v84_v7  ;;  %v99_v23 = vrot.slane %v77_v19, %v84_v7  ;;  %v106_v24 = vrot.slane %v78_v20, %v84_v7  ;;  %p672_p2 = scmp.ne.s32.totalorder %s582_s15, %s671_s16  ;;  %p677_p4 = scmp.lt.s32.totalorder %s671_s16, %s671_s16 }
  0x30   :  { %v193_v41 = vunpack.c.0.s8 %v192_v40 }
  0x31   :  { %v107_v25 = vcombine.low %v85_v21, %v92_v22  ;;  %v108_v26 = vcombine.low %v99_v23, %v106_v24  ;;  %p678_p5 = por %p677_p4, %p676_p3 }
  0x32   :  { %v765_v44 = vsub.s32 %v193_v41, %v83_v4 }
  0x33   :  { %v115_v27 = vrot.slane %v107_v25, %v84_v7  ;;  %v122_v28 = vrot.slane %v108_v26, %v84_v7  ;;  %p679_p6 = pnand %p678_p5, %p672_p2 }
  0x35   :  { %v123_v29 = vcombine.low %v115_v27, %v122_v28 }
  0x37   :  { %602 = vmatmul.mubr.msk.bf16.vlgmr.msra.gmra.mrb[0].mxu0 %vm129_vm3, %v123_v29 }
 0x10a   :  { %v171_v31 = vpop.f32.mrb[0].mxu0 }
 0x10b   :  { %v172_v32 = vadd.f32 %v594_v30, %v171_v31  ;;  %v603_v33 = vpop.f32.mrb[1].mxu0 }
 0x10c   :  { %v174_v34 = vpop.f32.mrb[2].mxu0 }
 0x10d   :  { %v178_v35 = vmul.f32 0.5, %v172_v32  ;;  %619 = vtanh.f32 %v172_v32  ;;  %v175_v36 = vadd.f32 %v594_v30, %v174_v34  ;;  %v604_v37 = vpop.f32.mrb[3].mxu0 }
 0x10f   :  { %621 = vtanh.f32 %v178_v35  ;;  %v179_v38 = vmul.f32 0.5, %v175_v36 }
 0x110   :  { %623 = vtanh.f32 %v175_v36 }
 0x111   :  { %625 = vtanh.f32 %v179_v38 }
 0x117   :  { %v620_v42 = vpop.eup %619 }
 0x118   :  { %317 = vrot.lane.b32.xlu0 %v620_v42, %s709_s13 }
 0x119   :  { %v622_v43 = vpop.eup %621 }
 0x11a   :  { %v182_v45 = vadd.f32 1.0, %v622_v43  ;;  %v624_v46 = vpop.eup %623 }
 0x11b   :  { %v626_v48 = vpop.eup %625 }
 0x11c   :  { %v184_v47 = vmul.f32 0.5, %v182_v45  ;;  %319 = vrot.lane.b32.xlu0 %v624_v46, %s709_s13  ;;  %v183_v51 = vadd.f32 1.0, %v626_v48  ;;  %v481_v46 = vld [vmem:[#allocation5] sm:$0x3] }
 0x11e   :  { %v197_v49 = vrot.slane %v184_v47, %v765_v44  ;;  %v190_v50 = vcombine.high %v184_v47, %v184_v47  ;;  %v185_v55 = vmul.f32 0.5, %v183_v51  ;;  %v313_v5 = vsub.f32 1.0, %v184_v47 }
 0x120   :  { %v230_v52 = vrot.slane %v197_v49, %v765_v44  ;;  %v205_v53 = vcombine.high %v197_v49, %v197_v49  ;;  %v204_v54 = vrot.slane %v190_v50, %v765_v44  ;;  %v214_v60 = vrot.slane %v185_v55, %v765_v44 }
 0x121   :  { %v207_v63 = vcombine.high %v185_v55, %v185_v55  ;;  %v314_v13 = vsub.f32 1.0, %v185_v55 }
 0x122   :  { %280 = vrot.lane.b32.xlu1 %v230_v52, %s710_s2  ;;  %449 = vrot.lane.b32.xlu0 %v230_v52, %s703_s0  ;;  %v237_v56 = vrot.slane %v205_v53, %v765_v44  ;;  %v206_v57 = vcombine.high %v204_v54, %v204_v54  ;;  %v244_v59 = vrot.slane %v204_v54, %v765_v44 }
 0x123   :  { %v258_v61 = vrot.slane %v214_v60, %v765_v44  ;;  %v222_v62 = vcombine.high %v214_v60, %v214_v60  ;;  %v221_v1 = vrot.slane %v207_v63, %v765_v44 }
 0x124   :  { %v251_v58 = vrot.slane %v206_v57, %v765_v44 }
 0x125   :  { %v265_v0 = vrot.slane %v222_v62, %v765_v44  ;;  %v272_v2 = vrot.slane %v221_v1, %v765_v44  ;;  %v223_v3 = vcombine.high %v221_v1, %v221_v1 }
 0x126   :  { %451 = vrot.lane.b32.xlu1 %v237_v56, %s703_s0  ;;  %282 = vrot.lane.b32.xlu0 %v237_v56, %s710_s2 }
 0x127   :  { %v279_v4 = vrot.slane %v223_v3, %v765_v44 }
 0x12a   :  { %455 = vrot.lane.b32.xlu1 %v251_v58, %s703_s0  ;;  %284 = vrot.lane.b32.xlu0 %v244_v59, %s710_s2 }
 0x12e   :  { %288 = vrot.lane.b32.xlu0 %v258_v61, %s710_s2 }
 0x132   :  { %453 = vrot.lane.b32.xlu0 %v244_v59, %s703_s0 }
 0x136   :  { %286 = vrot.lane.b32.xlu0 %v251_v58, %s710_s2 }
 0x13a   :  { %457 = vrot.lane.b32.xlu0 %v258_v61, %s703_s0 }
 0x13e   :  { %290 = vrot.lane.b32.xlu0 %v265_v0, %s710_s2 }
 0x142   :  { %292 = vrot.lane.b32.xlu0 %v272_v2, %s710_s2 }
 0x146   :  { %294 = vrot.lane.b32.xlu0 %v279_v4, %s710_s2 }
 0x14a   :  { %461 = vrot.lane.b32.xlu0 %v272_v2, %s703_s0 }
 0x18a   :  { %v318_v6 = vpop.permute.xlu0 %317 }
 0x18b   :  { %v323_v7 = vmul.f32 %v318_v6, %v313_v5 }
 0x18d   :  { %v334_v8 = vrot.slane %v323_v7, %v765_v44  ;;  %v327_v9 = vcombine.high %v323_v7, %v323_v7 }
 0x18e   :  { %v320_v12 = vpop.permute.xlu0 %319 }
 0x18f   :  { %v342_v10 = vcombine.high %v334_v8, %v334_v8  ;;  %v367_v11 = vrot.slane %v334_v8, %v765_v44  ;;  %v341_v14 = vrot.slane %v327_v9, %v765_v44  ;;  %v324_v15 = vmul.f32 %v320_v12, %v314_v13 }
 0x191   :  { %417 = vrot.lane.b32.xlu1 %v367_v11, %s710_s2  ;;  %v374_v16 = vrot.slane %v342_v10, %v765_v44  ;;  %v351_v19 = vrot.slane %v324_v15, %v765_v44  ;;  %v381_v20 = vrot.slane %v341_v14, %v765_v44  ;;  %v343_v24 = vcombine.high %v341_v14, %v341_v14 }
 0x192   :  { %v344_v29 = vcombine.high %v324_v15, %v324_v15 }
 0x193   :  { %v395_v23 = vrot.slane %v351_v19, %v765_v44  ;;  %v388_v27 = vrot.slane %v343_v24, %v765_v44  ;;  %v359_v30 = vcombine.high %v351_v19, %v351_v19 }
 0x194   :  { %v281_v17 = vpop.permute.xlu1 %280  ;;  %v450_v18 = vpop.permute.xlu0 %449  ;;  %v358_v32 = vrot.slane %v344_v29, %v765_v44 }
 0x195   :  { %305 = vst.msk [vmem:[#allocation2] sm:$0x3] %vm48_vm0, %v281_v17  ;;  %473 = vst.msk [vmem:[#allocation4] sm:$0x3] %vm48_vm0, %v450_v18  ;;  %419 = vrot.lane.b32.xlu1 %v374_v16, %s710_s2  ;;  %v402_v33 = vrot.slane %v359_v30, %v765_v44 }
 0x196   :  { %v409_v35 = vrot.slane %v358_v32, %v765_v44  ;;  %v360_v36 = vcombine.high %v358_v32, %v358_v32 }
 0x198   :  { %v452_v21 = vpop.permute.xlu1 %451  ;;  %v283_v22 = vpop.permute.xlu0 %282  ;;  %v416_v38 = vrot.slane %v360_v36, %v765_v44 }
 0x199   :  { %474 = vst.msk [vmem:[#allocation4 + $0x2] sm:$0x3] %vm48_vm0, %v452_v21  ;;  %306 = vst.msk [vmem:[#allocation2 + $0x2] sm:$0x3] %vm48_vm0, %v283_v22  ;;  %421 = vrot.lane.b32.xlu1 %v381_v20, %s710_s2 }
 0x19c   :  { %v456_v25 = vpop.permute.xlu1 %455  ;;  %v285_v26 = vpop.permute.xlu0 %284  ;;  %v482_v44 = vld [vmem:[#allocation2] sm:$0x3] }
 0x19d   :  { %476 = vst.msk [vmem:[#allocation4 + $0x6] sm:$0x3] %vm48_vm0, %v456_v25  ;;  %307 = vst.msk [vmem:[#allocation2 + $0x4] sm:$0x3] %vm48_vm0, %v285_v26  ;;  %425 = vrot.lane.b32.xlu1 %v395_v23, %s710_s2  ;;  %v483_v47 = vmul.f32 %v482_v44, %v481_v46  ;;  %v486_v52 = vld [vmem:[#allocation4] sm:$0x3] }
 0x1a0   :  { %v289_v28 = vpop.permute.xlu0 %288  ;;  %v492_v51 = vld [vmem:[#allocation2 + $0x2] sm:$0x3] }
 0x1a1   :  { %309 = vst.msk [vmem:[#allocation2 + $0x8] sm:$0x3] %vm48_vm0, %v289_v28  ;;  %423 = vrot.lane.b32.xlu1 %v388_v27, %s710_s2  ;;  %v498_v60 = vld [vmem:[#allocation4 + $0x2] sm:$0x3] }
 0x1a4   :  { %v454_v31 = vpop.permute.xlu0 %453  ;;  %v504_v59 = vld [vmem:[#allocation2 + $0x4] sm:$0x3]  ;;  %v522_v13 = vld [vmem:[#allocation4 + $0x6] sm:$0x3] }
 0x1a5   :  { %475 = vst.msk [vmem:[#allocation4 + $0x4] sm:$0x3] %vm48_vm0, %v454_v31  ;;  %459 = vrot.lane.b32.xlu1 %v265_v0, %s703_s0 }
 0x1a8   :  { %v287_v34 = vpop.permute.xlu0 %286  ;;  %v528_v12 = vld [vmem:[#allocation2 + $0x8] sm:$0x3] }
 0x1a9   :  { %308 = vst.msk [vmem:[#allocation2 + $0x6] sm:$0x3] %vm48_vm0, %v287_v34  ;;  %427 = vrot.lane.b32.xlu1 %v402_v33, %s710_s2 }
 0x1ac   :  { %v458_v37 = vpop.permute.xlu0 %457  ;;  %v510_v3 = vld [vmem:[#allocation4 + $0x4] sm:$0x3] }
 0x1ad   :  { %477 = vst.msk [vmem:[#allocation4 + $0x8] sm:$0x3] %vm48_vm0, %v458_v37  ;;  %429 = vrot.lane.b32.xlu1 %v409_v35, %s710_s2 }
 0x1b0   :  { %v291_v39 = vpop.permute.xlu0 %290  ;;  %v516_v7 = vld [vmem:[#allocation2 + $0x6] sm:$0x3] }
 0x1b1   :  { %310 = vst.msk [vmem:[#allocation2 + $0xa] sm:$0x3] %vm48_vm0, %v291_v39  ;;  %431 = vrot.lane.b32.xlu1 %v416_v38, %s710_s2 }
 0x1b4   :  { %v293_v40 = vpop.permute.xlu0 %292  ;;  %v534_v21 = vld [vmem:[#allocation4 + $0x8] sm:$0x3] }
 0x1b5   :  { %311 = vst.msk [vmem:[#allocation2 + $0xc] sm:$0x3] %vm48_vm0, %v293_v40  ;;  %463 = vrot.lane.b32.xlu1 %v279_v4, %s703_s0 }
 0x1b8   :  { %v295_v41 = vpop.permute.xlu0 %294  ;;  %v540_v20 = vld [vmem:[#allocation2 + $0xa] sm:$0x3] }
 0x1b9   :  { %312 = vst.msk [vmem:[#allocation2 + $0xe] sm:$0x3] %vm48_vm0, %v295_v41 }
 0x1bc   :  { %v462_v42 = vpop.permute.xlu0 %461  ;;  %v552_v28 = vld [vmem:[#allocation2 + $0xc] sm:$0x3] }
 0x1bd   :  { %479 = vst.msk [vmem:[#allocation4 + $0xc] sm:$0x3] %vm48_vm0, %v462_v42 }
 0x1c0   :  { %v564_v36 = vld [vmem:[#allocation2 + $0xe] sm:$0x3] }
 0x1c4   :  { %v558_v37 = vld [vmem:[#allocation4 + $0xc] sm:$0x3] }
 0x203   :  { %v418_v43 = vpop.permute.xlu1 %417 }
 0x204   :  { %441 = vst.msk [vmem:[#allocation3] sm:$0x3] %vm48_vm0, %v418_v43 }
 0x207   :  { %v420_v45 = vpop.permute.xlu1 %419 }
 0x208   :  { %442 = vst.msk [vmem:[#allocation3 + $0x2] sm:$0x3] %vm48_vm0, %v420_v45 }
 0x20b   :  { %v422_v48 = vpop.permute.xlu1 %421  ;;  %v484_v49 = vld [vmem:[#allocation3] sm:$0x3] }
 0x20c   :  { %443 = vst.msk [vmem:[#allocation3 + $0x4] sm:$0x3] %vm48_vm0, %v422_v48  ;;  %v485_v50 = vadd.f32 %v484_v49, %v483_v47 }
 0x20e   :  { %v487_v53 = vmul.f32 %v486_v52, %v485_v50  ;;  %v493_v54 = vmul.f32 %v492_v51, %v485_v50 }
 0x20f   :  { %v426_v55 = vpop.permute.xlu1 %425  ;;  %v495_v56 = vld [vmem:[#allocation3 + $0x2] sm:$0x3] }
 0x210   :  { %445 = vst.msk [vmem:[#allocation3 + $0x8] sm:$0x3] %vm48_vm0, %v426_v55  ;;  %v488_v57 = vpack.c.bf16 %v487_v53, %v487_v53  ;;  %v496_v58 = vadd.f32 %v495_v56, %v493_v54 }
 0x212   :  { %490 = vst.msk [vmem:[#allocation11] sm:$0x1] %vm489_vm4, %v488_v57  ;;  %v499_v61 = vmul.f32 %v498_v60, %v496_v58  ;;  %v505_v62 = vmul.f32 %v504_v59, %v496_v58 }
 0x213   :  { %v424_v63 = vpop.permute.xlu1 %423  ;;  %v507_v0 = vld [vmem:[#allocation3 + $0x4] sm:$0x3] }
 0x214   :  { %444 = vst.msk [vmem:[#allocation3 + $0x6] sm:$0x3] %vm48_vm0, %v424_v63  ;;  %v500_v1 = vpack.c.bf16 %v499_v61, %v499_v61  ;;  %v508_v2 = vadd.f32 %v507_v0, %v505_v62 }
 0x216   :  { %502 = vst.msk [vmem:[#allocation11 + $0x1] sm:$0x1] %vm489_vm4, %v500_v1  ;;  %v511_v4 = vmul.f32 %v510_v3, %v508_v2  ;;  %v517_v8 = vmul.f32 %v516_v7, %v508_v2 }
 0x217   :  { %v460_v5 = vpop.permute.xlu1 %459  ;;  %v531_v17 = vld [vmem:[#allocation3 + $0x8] sm:$0x3] }
 0x218   :  { %478 = vst.msk [vmem:[#allocation4 + $0xa] sm:$0x3] %vm48_vm0, %v460_v5  ;;  %v512_v6 = vpack.c.bf16 %v511_v4, %v511_v4 }
 0x21a   :  { %514 = vst.msk [vmem:[#allocation11 + $0x2] sm:$0x1] %vm489_vm4, %v512_v6 }
 0x21b   :  { %v428_v9 = vpop.permute.xlu1 %427  ;;  %v519_v10 = vld [vmem:[#allocation3 + $0x6] sm:$0x3] }
 0x21c   :  { %446 = vst.msk [vmem:[#allocation3 + $0xa] sm:$0x3] %vm48_vm0, %v428_v9  ;;  %v520_v11 = vadd.f32 %v519_v10, %v517_v8 }
 0x21e   :  { %v523_v14 = vmul.f32 %v522_v13, %v520_v11  ;;  %v529_v15 = vmul.f32 %v528_v12, %v520_v11 }
 0x21f   :  { %v430_v16 = vpop.permute.xlu1 %429  ;;  %v546_v29 = vld [vmem:[#allocation4 + $0xa] sm:$0x3] }
 0x220   :  { %447 = vst.msk [vmem:[#allocation3 + $0xc] sm:$0x3] %vm48_vm0, %v430_v16  ;;  %v524_v18 = vpack.c.bf16 %v523_v14, %v523_v14  ;;  %v532_v19 = vadd.f32 %v531_v17, %v529_v15 }
 0x222   :  { %526 = vst.msk [vmem:[#allocation11 + $0x3] sm:$0x1] %vm489_vm4, %v524_v18  ;;  %v535_v22 = vmul.f32 %v534_v21, %v532_v19  ;;  %v541_v23 = vmul.f32 %v540_v20, %v532_v19 }
 0x223   :  { %v432_v24 = vpop.permute.xlu1 %431  ;;  %v543_v25 = vld [vmem:[#allocation3 + $0xa] sm:$0x3] }
 0x224   :  { %448 = vst.msk [vmem:[#allocation3 + $0xe] sm:$0x3] %vm48_vm0, %v432_v24  ;;  %v536_v26 = vpack.c.bf16 %v535_v22, %v535_v22  ;;  %v544_v27 = vadd.f32 %v543_v25, %v541_v23 }
 0x226   :  { %538 = vst.msk [vmem:[#allocation11 + $0x4] sm:$0x1] %vm489_vm4, %v536_v26  ;;  %v547_v30 = vmul.f32 %v546_v29, %v544_v27  ;;  %v553_v31 = vmul.f32 %v552_v28, %v544_v27 }
 0x227   :  { %v464_v32 = vpop.permute.xlu1 %463  ;;  %v555_v33 = vld [vmem:[#allocation3 + $0xc] sm:$0x3] }
 0x228   :  { %480 = vst.msk [vmem:[#allocation4 + $0xe] sm:$0x3] %vm48_vm0, %v464_v32  ;;  %v548_v34 = vpack.c.bf16 %v547_v30, %v547_v30  ;;  %v556_v35 = vadd.f32 %v555_v33, %v553_v31 }
 0x22a   :  { %550 = vst.msk [vmem:[#allocation11 + $0x5] sm:$0x1] %vm489_vm4, %v548_v34  ;;  %v559_v38 = vmul.f32 %v558_v37, %v556_v35  ;;  %v565_v39 = vmul.f32 %v564_v36, %v556_v35 }
 0x22b   :  { %v567_v40 = vld [vmem:[#allocation3 + $0xe] sm:$0x3] }
 0x22c   :  { %v560_v41 = vpack.c.bf16 %v559_v38, %v559_v38  ;;  %v568_v42 = vadd.f32 %v567_v40, %v565_v39 }
 0x22e   :  { %562 = vst.msk [vmem:[#allocation11 + $0x6] sm:$0x1] %vm489_vm4, %v560_v41 }
 0x22f   :  { %575 = vst.msk [vmem:[#allocation5] sm:$0x3] %vm48_vm0, %v568_v42  ;;  %v570_v43 = vld [vmem:[#allocation4 + $0xe] sm:$0x3] }
 0x230   :  { %v571_v44 = vmul.f32 %v570_v43, %v568_v42 }
 0x232   :  { %v572_v45 = vpack.c.bf16 %v571_v44, %v571_v44 }
 0x234   :  { %574 = vst.msk [vmem:[#allocation11 + $0x7] sm:$0x1] %vm489_vm4, %v572_v45 }
 0x235   :  { %682 = shalt.err (!%p679_p6)
}
 0x236   :  { %s683_s19 = scalar_lea.hbm %s866_s3, 128 }
 0x237   :  { %p684_p7 = scmp.ne.s32.totalorder %s866_s3, %s683_s19  ;;  %p687_p8 = scmp.lt.u32.totalorder %s683_s19, %s866_s3 }
 0x239   :  { %p689_p9 = pnand %p687_p8, %p684_p7 }
 0x23b   :  { %692 = shalt.err (!%p689_p9)
}
 0x23c   :  { %587 = dma.vmem_to_hbm [thread:$0]  %s582_s15, 128, %s866_s3, [#allocation8], %s700_s22, %s700_s22, %s701_s23  }
 0x23d   :  { %697 = dma.done.wait [#allocation8], 128  }
 0x23e   :  { %698 = vsyncadd [#allocation8], 4294967168 }
 0x23f   :  { %591 = vsyncpa [#allocation7], 1 }
 0x240   :  { %592 = vsyncpa [#allocation10], 1 }
 0x241   :  { %593 = vsyncpa [#allocation8], 1 }

</bundles_post_ra>
